<compile_context>
chip_gen: v6e
topology: v6e:2x2x1
jax: 0.10.0
libtpu: 0.0.40
codegen_flags: <defaults>
</compile_context>

<pallas_src>
import functools

import jax
import jax.numpy as jnp
from jax.experimental import pallas as pl
from jax.experimental.pallas import tpu as pltpu


def _res_conv_kernel(xp_ref, w_ref, b_ref, o_ref, *, B, H, W, C):
    """Fused conv3x3 + bias + alpha-scale + residual, one MXU matmul.

    xp_ref: (B*(H+2), (W+2)*C) bf16  padded, channel-packed, batch-stacked x
    w_ref : ((W+2)*C, 3*W*C)   bf16  kh-concatenated shift-packed weights
                                     (alpha and the +1 identity tap folded in)
    b_ref : (1, B*W*C)         f32   alpha*bias tiled over output lanes
    o_ref : (H, B*W*C)         f32   lane-dense output (batch along lanes)
    """
    WC = W * C
    Hp = H + 2
    # Single MXU push: all batches (M = B*(H+2)) x all 3 kernel rows (N = 3*W*C).
    p = jnp.dot(xp_ref[...], w_ref[...], preferred_element_type=jnp.float32)
    cols = []
    for b in range(B):                      # static unroll, B is tiny
        r0 = b * Hp
        acc = (p[r0 + 0:r0 + 0 + H, 0:WC]
               + p[r0 + 1:r0 + 1 + H, WC:2 * WC]
               + p[r0 + 2:r0 + 2 + H, 2 * WC:3 * WC])
        cols.append(acc)
    out = cols[0] if B == 1 else jnp.concatenate(cols, axis=-1)
    o_ref[...] = (out + b_ref[...]).astype(o_ref.dtype)


def pack_simple_res_params(weight_oihw, bias, alpha, W, B):
    """Fold alpha + residual identity into a shift-packed conv weight matrix.

    w_packed[wi*Cin+ci, kh*W*Cout + wo*Cout + co] =
        alpha*weight[co, ci, kh, wi-wo] + 1.0*(kh==1, wi-wo==1, ci==co)
        (zero outside 0 <= wi-wo < 3)
    b_packed = alpha*bias tiled to the (1, B*W*Cout) output lane layout.
    """
    scale = 1.0 if alpha is None else float(alpha)
    Cout, Cin, KH, KW = weight_oihw.shape
    Wp = W + 2

    ident = jnp.zeros((Cout, Cin, KH, KW), jnp.float32)
    ident = ident.at[:, :, 1, 1].set(jnp.eye(Cout, Cin, dtype=jnp.float32))
    w_eff = scale * weight_oihw.astype(jnp.float32) + ident       # (Cout,Cin,3,3)

    w_t = jnp.transpose(w_eff, (2, 3, 1, 0))                      # (KH,KW,Cin,Cout)
    wi = jnp.arange(Wp)[:, None]                                  # padded input col
    wo = jnp.arange(W)[None, :]                                   # output col
    kw = wi - wo                                                  # (Wp, W)
    valid = (kw >= 0) & (kw < KW)
    big = w_t[:, jnp.clip(kw, 0, KW - 1), :, :]                   # (KH,Wp,W,Cin,Cout)
    big = jnp.where(valid[None, :, :, None, None], big, 0.0)
    big = jnp.transpose(big, (1, 3, 0, 2, 4))                     # (Wp,Cin,KH,W,Cout)
    w_packed = big.reshape(Wp * Cin, KH * W * Cout).astype(jnp.bfloat16)

    b_packed = jnp.tile(scale * bias.astype(jnp.float32),
                        B * W).reshape(1, B * W * Cout)
    return w_packed, b_packed


@jax.jit
def simple_res_forward(x_nchw, w_packed, b_packed):
    """y = alpha*conv3x3(x) + x using pre-packed kernel parameters."""
    B, C, H, W = x_nchw.shape
    Wp = W + 2
    WC = W * C

    # NCHW -> padded channels-last, batch-stacked (B*(H+2), (W+2)*C) in bf16.
    # transpose + pad + cast + reshape fuse into one XLA pass under jit.
    x = jnp.transpose(x_nchw, (0, 2, 3, 1))
    x = jnp.pad(x, ((0, 0), (1, 1), (1, 1), (0, 0)))
    xp = x.astype(jnp.bfloat16).reshape(B * (H + 2), Wp * C)

    out_flat = pl.pallas_call(
        functools.partial(_res_conv_kernel, B=B, H=H, W=W, C=C),
        out_shape=jax.ShapeDtypeStruct((H, B * WC), jnp.float32),
        grid_spec=pltpu.PrefetchScalarGridSpec(
            num_scalar_prefetch=0,
            grid=(1,),                        # whole problem in one grid step
            in_specs=[
                pl.BlockSpec((B * (H + 2), Wp * C), lambda i: (0, 0)),
                pl.BlockSpec((Wp * C, 3 * WC), lambda i: (0, 0)),
                pl.BlockSpec((1, B * WC), lambda i: (0, 0)),
            ],
            out_specs=pl.BlockSpec((H, B * WC), lambda i: (0, 0)),
        ),
        compiler_params=pltpu.CompilerParams(
            dimension_semantics=("arbitrary",)),
    )(xp, w_packed, b_packed)

    # (H, B*W*C) -> (H, B, W, C) -> (B, C, H, W)
    out = out_flat.reshape(H, B, W, C)
    return jnp.transpose(out, (1, 3, 0, 2))


if __name__ == "__main__":
    B, C, H, W = 2, 4, 16, 16
    alpha = 0.5

    key = jax.random.PRNGKey(0)
    kx, kw, kb = jax.random.split(key, 3)
    x = jax.random.normal(kx, (B, C, H, W), dtype=jnp.float32)
    weight = jax.random.normal(kw, (C, C, 3, 3), dtype=jnp.float32) * 0.1
    bias = jax.random.normal(kb, (C,), dtype=jnp.float32) * 0.1

    # Packing hoisted out of the per-forward path (done once per weight set).
    w_packed, b_packed = pack_simple_res_params(weight, bias, alpha, W, B)
    w_packed, b_packed = jax.block_until_ready((w_packed, b_packed))

    y = simple_res_forward(x, w_packed, b_packed)
    y = jax.block_until_ready(y)

    # Pure-JAX f32 reference of the module forward: alpha*conv3x3(x) + x.
    x_nhwc = jnp.transpose(x, (0, 2, 3, 1))
    w_hwio = jnp.transpose(weight, (2, 3, 1, 0))
    conv = jax.lax.conv_general_dilated(
        x_nhwc, w_hwio, window_strides=(1, 1), padding="SAME",
        dimension_numbers=("NHWC", "HWIO", "NHWC")) + bias
    ref = jnp.transpose(conv * alpha + x_nhwc, (0, 3, 1, 2))

    assert y.shape == (B, C, H, W)
    # bf16 activations/weights in the kernel -> relaxed tolerance vs f32 ref.
    assert jnp.allclose(y, ref, atol=5e-2, rtol=5e-2), "mismatch vs reference"
    print("KERNEL_OK")
</pallas_src>

<mosaic_0001>
module attributes {stable_mosaic.version = 11 : i64} {
  func.func @_res_conv_kernel(%arg0: i32, %arg1: memref<36x72xbf16, #tpu.memory_space<vmem>>, %arg2: memref<72x192xbf16, #tpu.memory_space<vmem>>, %arg3: memref<1x128xf32, #tpu.memory_space<vmem>>, %arg4: memref<16x128xf32, #tpu.memory_space<vmem>>) attributes {dimension_semantics = [#tpu.dimension_semantics<arbitrary>], iteration_bounds = array<i64: 1>, scalar_prefetch = 0 : i64, scratch_operands = 0 : i64, tpu.core_type = #tpu.core_type<tc>, window_params = [{pipeline_mode = #tpu.pipeline_mode<synchronous>, transform_indices = @transform_0, window_bounds = array<i64: 36, 72>}, {pipeline_mode = #tpu.pipeline_mode<synchronous>, transform_indices = @transform_1, window_bounds = array<i64: 72, 192>}, {pipeline_mode = #tpu.pipeline_mode<synchronous>, transform_indices = @transform_2, window_bounds = array<i64: 1, 128>}, {pipeline_mode = #tpu.pipeline_mode<synchronous>, transform_indices = @transform_3, window_bounds = array<i64: 16, 128>}]} {
    %c0 = arith.constant 0 : index
    %c0_0 = arith.constant 0 : index
    %0 = vector.load %arg1[%c0, %c0_0] : memref<36x72xbf16, #tpu.memory_space<vmem>>, vector<36x72xbf16>
    %c0_1 = arith.constant 0 : index
    %c0_2 = arith.constant 0 : index
    %1 = vector.load %arg2[%c0_1, %c0_2] : memref<72x192xbf16, #tpu.memory_space<vmem>>, vector<72x192xbf16>
    %cst = arith.constant dense<0.000000e+00> : vector<36x192xf32>
    %2 = tpu.matmul %0, %1, %cst {dimension_numbers = #tpu.dot_dimension_numbers<[1], [0], [0], [1], [0, 0, 1, 1], [], []>} : vector<36x72xbf16>, vector<72x192xbf16>, vector<36x192xf32> -> vector<36x192xf32>
    %3 = vector.extract_strided_slice %2 {offsets = [0, 0], sizes = [16, 64], strides = [1, 1]} : vector<36x192xf32> to vector<16x64xf32>
    %4 = vector.extract_strided_slice %2 {offsets = [1, 64], sizes = [16, 64], strides = [1, 1]} : vector<36x192xf32> to vector<16x64xf32>
    %5 = arith.addf %3, %4 : vector<16x64xf32>
    %6 = vector.extract_strided_slice %2 {offsets = [2, 128], sizes = [16, 64], strides = [1, 1]} : vector<36x192xf32> to vector<16x64xf32>
    %7 = arith.addf %5, %6 : vector<16x64xf32>
    %8 = vector.extract_strided_slice %2 {offsets = [18, 0], sizes = [16, 64], strides = [1, 1]} : vector<36x192xf32> to vector<16x64xf32>
    %9 = vector.extract_strided_slice %2 {offsets = [19, 64], sizes = [16, 64], strides = [1, 1]} : vector<36x192xf32> to vector<16x64xf32>
    %10 = arith.addf %8, %9 : vector<16x64xf32>
    %11 = vector.extract_strided_slice %2 {offsets = [20, 128], sizes = [16, 64], strides = [1, 1]} : vector<36x192xf32> to vector<16x64xf32>
    %12 = arith.addf %10, %11 : vector<16x64xf32>
    %13 = tpu.concatenate %7, %12 in 1 : vector<16x64xf32>, vector<16x64xf32> -> vector<16x128xf32>
    %c0_3 = arith.constant 0 : index
    %c0_4 = arith.constant 0 : index
    %14 = vector.load %arg3[%c0_3, %c0_4] : memref<1x128xf32, #tpu.memory_space<vmem>>, vector<1x128xf32>
    %15 = vector.broadcast %14 : vector<1x128xf32> to vector<16x128xf32>
    %16 = arith.addf %13, %15 : vector<16x128xf32>
    %c0_5 = arith.constant 0 : index
    %c0_6 = arith.constant 0 : index
    %17 = vector.load %arg4[%c0_5, %c0_6] : memref<16x128xf32, #tpu.memory_space<vmem>>, vector<16x128xf32>
    tpu.vector_store %arg4[%c0_5, %c0_6], %16 {strides = array<i32>} : memref<16x128xf32, #tpu.memory_space<vmem>>, vector<16x128xf32>,
    return
  }
  func.func @transform_0(%arg0: i32) -> (i32, i32) {
    %c0_i32 = arith.constant 0 : i32
    %c0_i32_0 = arith.constant 0 : i32
    %c0_i32_1 = arith.constant 0 : i32
    return %c0_i32, %c0_i32_0 : i32, i32
  }
  func.func @transform_1(%arg0: i32) -> (i32, i32) {
    %c0_i32 = arith.constant 0 : i32
    %c0_i32_0 = arith.constant 0 : i32
    %c0_i32_1 = arith.constant 0 : i32
    return %c0_i32, %c0_i32_0 : i32, i32
  }
  func.func @transform_2(%arg0: i32) -> (i32, i32) {
    %c0_i32 = arith.constant 0 : i32
    %c0_i32_0 = arith.constant 0 : i32
    %c0_i32_1 = arith.constant 0 : i32
    return %c0_i32, %c0_i32_0 : i32, i32
  }
  func.func @transform_3(%arg0: i32) -> (i32, i32) {
    %c0_i32 = arith.constant 0 : i32
    %c0_i32_0 = arith.constant 0 : i32
    %c0_i32_1 = arith.constant 0 : i32
    return %c0_i32, %c0_i32_0 : i32, i32
  }
}

</mosaic_0001>

<bundles_post_ra>
// kernel: simple_res_forward.1
= control target key start
LH: loop header
LB: loop body
LE: loop exit
PB: predicated region body
PF: predicated region fallthrough
CT: control target
= control target key end

     0   :  { %vm97_vm0 = vcmask 1043456   ;;  %v304_v1 = vmov 0   ;;  %vm87_vm1 = vcmask 588800   ;;  %vm168_vm2 = vcmask 1046528   ;;  %s388_s1 = inlined_call_operand.vmem [shape: bf16[72,192], index: 1, kind: input, shape index: {}]   ;;  %s389_s0 = inlined_call_operand.vmem [shape: bf16[36,72], index: 0, kind: input, shape index: {}]   ;;  %s390_s2 = inlined_call_operand.vmem [shape: f32[1,128], index: 2, kind: input, shape index: {}]   ;;  %s391_s3 = inlined_call_operand.vmem [shape: f32[16,128], index: 3, kind: output, shape index: {}]  }
   0x1   :  { %v28_v0 = vld [vmem:[%s388_s1 + $0x40] sm:$0xff]  ;;  %136 = vmatprep.mubr.bf16.mxu0 %v304_v1  ;;  %146 = vmatprep.mubr.bf16.mxu1 %v304_v1  ;;  %v289_v4 = vld [vmem:[%s388_s1 + $0x34] ss:$8 sps:$4 sm:$0xff]   ;;  %v291_v6 = vld [vmem:[%s388_s1 + $0x30] ss:$8 sps:$4 sm:$0xff]   ;;  %vm185_vm3 = vcmask 1045504  }
   0x2   :  { %v269_v2 = vcombine.high %v28_v0, %v28_v0  ;;  %v268_v3 = vcombine.low %v28_v0, %v28_v0  ;;  %v292_v7 = vld [vmem:[%s388_s1 + $0x24] ss:$8 sps:$4 sm:$0xff]   ;;  %v294_v8 = vld [vmem:[%s388_s1 + $0x20] ss:$8 sps:$4 sm:$0xff]   ;;  %v295_v9 = vld [vmem:[%s388_s1 + $0x14] ss:$8 sps:$4 sm:$0xff]  }
   0x3   :  { %v297_v10 = vld [vmem:[%s388_s1 + $0x10] ss:$8 sps:$4 sm:$0xff]   ;;  %v298_v11 = vld [vmem:[%s388_s1 + $0x4] ss:$8 sps:$4 sm:$0xff]   ;;  %v300_v12 = vld [vmem:[%s388_s1] ss:$8 sps:$4 sm:$0xff]  }
   0x4   :  { %270 = vmatprep.subr.msk.bf16.mxu0 %vm97_vm0, %v269_v2  ;;  %275 = vmatprep.subr.msk.bf16.mxu1 %vm97_vm0, %v269_v2  ;;  %v99_v5 = vsel %vm97_vm0, %v268_v3, 0  ;;  %v301_v13 = vld [vmem:[%s389_s0] sm:$0xff]   ;;  %v302_v14 = vld [vmem:[%s389_s0 + $0x8] sm:$0xff]   ;;  %v303_v15 = vld [vmem:[%s389_s0 + $0x10] ss:$0 sps:$4 sm:$0x33]  }
   0x5   :  { %111 = vmatpush1.bf16.msra.mxu0 %v99_v5  ;;  %280 = vmatpush1.bf16.msra.mxu1 %v99_v5  ;;  %s305_s1 = smov 64   ;;  %vm239_vm4 = vcmask 523264   ;;  %v274_v2 = vld [vmem:[%s390_s2] ss:$0 sm:$0xff] }
   0x6   :  { %112 = vmatprep.subr.bf16.mxu0 %v289_v4  ;;  %276 = vmatprep.subr.bf16.mxu1 %v289_v4 }
   0x9   :  { %113 = vmatpush1.bf16.msra.mxu0 %v291_v6  ;;  %281 = vmatpush1.bf16.msra.mxu1 %v291_v6 }
   0xa   :  { %114 = vmatprep.subr.bf16.mxu0 %v292_v7  ;;  %277 = vmatprep.subr.bf16.mxu1 %v292_v7 }
   0xd   :  { %115 = vmatpush1.bf16.msra.mxu0 %v294_v8  ;;  %282 = vmatpush1.bf16.msra.mxu1 %v294_v8 }
   0xe   :  { %116 = vmatprep.subr.bf16.mxu0 %v295_v9  ;;  %278 = vmatprep.subr.bf16.mxu1 %v295_v9 }
  0x11   :  { %117 = vmatpush1.bf16.msra.mxu0 %v297_v10  ;;  %283 = vmatpush1.bf16.msra.mxu1 %v297_v10 }
  0x12   :  { %118 = vmatprep.subr.bf16.mxu0 %v298_v11  ;;  %279 = vmatprep.subr.bf16.mxu1 %v298_v11 }
  0x15   :  { %119 = vmatpush1.bf16.msra.mxu0 %v300_v12  ;;  %284 = vmatpush1.bf16.msra.mxu1 %v300_v12 }
  0x18   :  { %271 = vmatmul.mubr.msk.bf16.vlgmr.msra.gmra.mxu0 %vm87_vm1, %v301_v13  ;;  %272 = vmatmul.mubr.msk.bf16.vlgmr.msra.gmra.mxu1 %vm87_vm1, %v302_v14 }
  0x19   :  { %156 = vmatprep.mubr.bf16.mxu1 %v304_v1 }
  0x20   :  { %273 = vmatmul.mubr.msk.bf16.gmra.mxu1 %vm87_vm1, %v303_v15 }
  0xd8   :  { %v138_v16 = vpop.f32.mrf.mxu0  ;;  %v148_v17 = vpop.f32.mrf.mxu1 }
  0xd9   :  { %v172_v21 = vrot.slane %v148_v17, 1  ;;  %v169_v28 = vrot.slane %v138_v16, 1 }
  0xda   :  { %v150_v18 = vpop.f32.mrf.mxu1  ;;  %v140_v19 = vpop.f32.mrf.mxu0 }
  0xdb   :  { %v189_v24 = vrot.slane %v150_v18, 2  ;;  %v186_v58 = vrot.slane %v140_v19, 2 }
  0xdc   :  { %v152_v20 = vpop.f32.mrf.mxu1  ;;  %v142_v25 = vpop.f32.mrf.mxu0 }
  0xdd   :  { %v197_v22 = vrot.slane %v152_v20, 1  ;;  %v170_v32 = vrot.slane %v142_v25, 1 }
  0xde   :  { %v154_v23 = vpop.f32.mrf.mxu1  ;;  %v144_v55 = vpop.f32.mrf.mxu0 }
  0xdf   :  { %v215_v26 = vrot.slane %v154_v23, 2  ;;  %v198_v27 = vsel %vm168_vm2, %v172_v21, %v197_v22  ;;  %v171_v37 = vsel %vm168_vm2, %v169_v28, %v170_v32  ;;  %v173_v40 = vsel %vm168_vm2, %v170_v32, %v172_v21 }
  0xe0   :  { %201 = vrot.lane.b32.xlu0 %v198_v27, %s305_s1  ;;  %v158_v29 = vpop.f32.mrf.mxu1  ;;  %v187_v59 = vrot.slane %v144_v55, 2 }
  0xe1   :  { %v199_v30 = vrot.slane %v158_v29, 1  ;;  %v216_v31 = vsel %vm185_vm3, %v189_v24, %v215_v26 }
  0xe2   :  { %v160_v33 = vpop.f32.mrf.mxu1  ;;  %v188_v62 = vsel %vm185_vm3, %v186_v58, %v187_v59  ;;  %v190_v63 = vsel %vm185_vm3, %v187_v59, %v189_v24 }
  0xe3   :  { %v217_v34 = vrot.slane %v160_v33, 2  ;;  %205 = vrot.lane.b32.xlu1 %v199_v30, %s305_s1  ;;  %v200_v35 = vsel %vm168_vm2, %v197_v22, %v199_v30 }
  0xe4   :  { %203 = vrot.lane.b32.xlu0 %v200_v35, %s305_s1  ;;  %v162_v36 = vpop.f32.mrf.mxu1 }
  0xe5   :  { %v218_v38 = vsel %vm185_vm3, %v215_v26, %v217_v34 }
  0xe6   :  { %v163_v39 = vpop.f32.mrf.mxu1 }
  0xe7   :  { %174 = vrot.lane.b32.xlu1 %v171_v37, %s305_s1 }
  0xe8   :  { %176 = vrot.lane.b32.xlu0 %v173_v40, %s305_s1 }
 0x152   :  { %v202_v41 = vpop.permute.xlu0 %201 }
 0x153   :  { %v210_v42 = vadd.f32 %v202_v41, %v148_v17 }
 0x155   :  { %v206_v43 = vpop.permute.xlu1 %205  ;;  %v222_v46 = vadd.f32 %v216_v31, %v210_v42 }
 0x156   :  { %v212_v44 = vadd.f32 %v206_v43, %v158_v29  ;;  %v204_v45 = vpop.permute.xlu0 %203 }
 0x157   :  { %v211_v47 = vadd.f32 %v204_v45, %v152_v20  ;;  %v228_v51 = vrot.slane %v222_v46, 2 }
 0x158   :  { %v224_v48 = vadd.f32 %v217_v34, %v212_v44 }
 0x159   :  { %v223_v49 = vadd.f32 %v218_v38, %v211_v47  ;;  %v175_v56 = vpop.permute.xlu1 %174 }
 0x15a   :  { %v231_v50 = vrot.slane %v224_v48, 2  ;;  %v177_v57 = vpop.permute.xlu0 %176  ;;  %v180_v60 = vadd.f32 %v175_v56, %v138_v16 }
 0x15b   :  { %v229_v52 = vrot.slane %v223_v49, 2  ;;  %v181_v61 = vadd.f32 %v177_v57, %v142_v25 }
 0x15c   :  { %v193_v0 = vadd.f32 %v188_v62, %v180_v60 }
 0x15d   :  { %v232_v53 = vsel %vm185_vm3, %v229_v52, %v231_v50  ;;  %v230_v54 = vsel %vm185_vm3, %v228_v51, %v229_v52  ;;  %v194_v1 = vadd.f32 %v190_v63, %v181_v61 }
 0x15e   :  { %235 = vrot.lane.b32.xlu0 %v232_v53, %s305_s1  ;;  %233 = vrot.lane.b32.xlu1 %v230_v54, %s305_s1 }
 0x1d0   :  { %v236_v3 = vpop.permute.xlu0 %235  ;;  %v234_v4 = vpop.permute.xlu1 %233 }
 0x1d1   :  { %v241_v5 = vsel %vm239_vm4, %v194_v1, %v236_v3  ;;  %v240_v6 = vsel %vm239_vm4, %v193_v0, %v234_v4 }
 0x1d2   :  { %v250_v7 = vadd.f32 %v274_v2, %v241_v5  ;;  %v249_v8 = vadd.f32 %v274_v2, %v240_v6 }
 0x1d4   :  { %252 = vst [vmem:[%s391_s3 + $0x8] sm:$0xff] %v250_v7  ;;  %251 = vst [vmem:[%s391_s3] sm:$0xff] %v249_v8 }

</bundles_post_ra>
